<compile_context>
chip_gen: v7x
topology: tpu7x:2x2x1
jax: 0.10.0
libtpu: 0.0.40
codegen_flags: <defaults>
</compile_context>

<pallas_src>
import functools

import jax
import jax.numpy as jnp
from jax.experimental import pallas as pl
from jax.experimental.pallas import tpu as pltpu

LANES = 128
_TARGET_BLOCK_BYTES = 4 * 1024 * 1024   # 4 MiB per input block per grid step
_VMEM_LIMIT_BYTES = 32 * 1024 * 1024    # 2 inputs x 2 buffers x 4 MiB + headroom
_NUM_PARALLEL_CHUNKS = 2                # feeds both TCs on v7x; harmless on v5e/v6e


def _mse_sum_single_kernel(x_ref, t_ref, out_ref):
    """Single-block path: whole slab fits in one block; one reduce to SMEM scalar."""
    d = x_ref[...].astype(jnp.float32) - t_ref[...].astype(jnp.float32)
    out_ref[0, 0] = jnp.sum(d * d)


def _mse_partial_kernel(x_ref, t_ref, out_ref, acc_ref, *,
                        rows, block_rows, inner, mask_from_block):
    """Per-chunk partial sums of (x - t)^2 into a vreg-sized (8,128) accumulator."""
    p = pl.program_id(0)   # parallel chunk (maps onto a TensorCore on v7x)
    i = pl.program_id(1)   # sequential reduction step within this chunk

    @pl.when(i == 0)
    def _():
        acc_ref[...] = jnp.zeros_like(acc_ref)

    d = x_ref[...].astype(jnp.float32) - t_ref[...].astype(jnp.float32)
    sq = d * d
    logical_block = p * inner + i  # block index along the row axis this step covers

    def _accum(vals):
        # (block_rows,128) -> (block_rows//8, 8, 128): reshape stays inside (8,128)
        # tiles (free); the axis-0 sum is pure VPU vreg adds, no XLU per step.
        acc_ref[...] += vals.reshape(-1, 8, LANES).sum(axis=0)

    if mask_from_block is None:
        _accum(sq)                           # exact cover: never mask
    else:
        @pl.when(logical_block < mask_from_block)
        def _():
            _accum(sq)                       # steady state: unmasked

        @pl.when(logical_block >= mask_from_block)
        def _():
            # Ragged last block and/or fully-out-of-range overhang block: zero OOB rows.
            row_ids = (jax.lax.broadcasted_iota(jnp.int32, sq.shape, 0)
                       + logical_block * block_rows)
            _accum(jnp.where(row_ids < rows, sq, 0.0))

    @pl.when(i == inner - 1)
    def _():
        out_ref[...] = acc_ref[...]          # one (8,128) store per chunk


def content_loss(x, target, *, max_block_rows=None):
    """Returns (x, loss) with loss = mean((x - target)**2) computed in Pallas.

    Matches ContentLoss.forward: the input is returned unchanged (pass-through);
    the MSE scalar corresponds to the module's `self.loss` attribute.
    """
    assert x.shape == target.shape, "input/target shape mismatch"
    n_elems = x.size
    itemsize = jnp.dtype(x.dtype).itemsize

    # Sublane packing of the input dtype: f32 -> 8, bf16 -> 16, int8/fp8 -> 32.
    sub = max(8, 32 // max(itemsize, 1))
    if max_block_rows is None:
        max_block_rows = _TARGET_BLOCK_BYTES // (LANES * itemsize)
    block_rows_cap = max(sub, (max_block_rows // sub) * sub)

    xf = x.reshape(-1)
    tf = target.reshape(-1)
    n_main = (n_elems // LANES) * LANES
    rows = n_main // LANES

    # <128-element lane tail: summed in plain XLA (tiny) instead of padding full copies.
    tail_sum = jnp.float32(0.0)
    if n_main != n_elems:
        # TODO(synk): the slice below copies the main body when a lane tail exists;
        # still cheaper than the old full jnp.pad of both arrays.
        dt = xf[n_main:].astype(jnp.float32) - tf[n_main:].astype(jnp.float32)
        tail_sum = jnp.sum(dt * dt)

    if rows == 0:
        sum_sq = tail_sum
    else:
        x2d = (xf if n_main == n_elems else xf[:n_main]).reshape(rows, LANES)
        t2d = (tf if n_main == n_elems else tf[:n_main]).reshape(rows, LANES)
        cost = pl.CostEstimate(flops=3 * n_main, transcendentals=0,
                               bytes_accessed=2 * n_main * itemsize)

        if rows <= block_rows_cap:
            # Small path: one grid step over the full slab, direct reduce to SMEM.
            main_sum = pl.pallas_call(
                _mse_sum_single_kernel,
                out_shape=jax.ShapeDtypeStruct((1, 1), jnp.float32),
                grid_spec=pltpu.PrefetchScalarGridSpec(
                    num_scalar_prefetch=0,
                    grid=(1,),
                    in_specs=[pl.BlockSpec((rows, LANES), lambda i: (0, 0)),
                              pl.BlockSpec((rows, LANES), lambda i: (0, 0))],
                    out_specs=pl.BlockSpec(memory_space=pltpu.SMEM),
                ),
                compiler_params=pltpu.CompilerParams(
                    dimension_semantics=("arbitrary",),
                    vmem_limit_bytes=_VMEM_LIMIT_BYTES,
                ),
                cost_estimate=cost,
            )(x2d, t2d)[0, 0]
        else:
            block_rows = block_rows_cap
            nblocks = (rows + block_rows - 1) // block_rows         # >= 2 here
            p_chunks = _NUM_PARALLEL_CHUNKS if nblocks >= _NUM_PARALLEL_CHUNKS else 1
            inner = (nblocks + p_chunks - 1) // p_chunks
            last_block = nblocks - 1

            if rows % block_rows != 0:
                mask_from_block = nblocks - 1    # ragged last block (+ any overhang)
            elif p_chunks * inner != nblocks:
                mask_from_block = nblocks        # only the fully-OOB overhang step(s)
            else:
                mask_from_block = None           # exact cover: no masking anywhere

            def in_map(p, i):
                # Clamp so overhang steps re-read the last valid block (fully masked).
                return (jnp.minimum(p * inner + i, last_block), 0)

            kernel = functools.partial(
                _mse_partial_kernel, rows=rows, block_rows=block_rows,
                inner=inner, mask_from_block=mask_from_block)

            partials = pl.pallas_call(
                kernel,
                out_shape=jax.ShapeDtypeStruct((p_chunks, 8, LANES), jnp.float32),
                grid_spec=pltpu.PrefetchScalarGridSpec(
                    num_scalar_prefetch=0,
                    grid=(p_chunks, inner),
                    in_specs=[pl.BlockSpec((block_rows, LANES), in_map),
                              pl.BlockSpec((block_rows, LANES), in_map)],
                    out_specs=pl.BlockSpec((None, 8, LANES), lambda p, i: (p, 0, 0)),
                    scratch_shapes=[pltpu.VMEM((8, LANES), jnp.float32)],
                ),
                compiler_params=pltpu.CompilerParams(
                    dimension_semantics=("parallel", "arbitrary"),
                    vmem_limit_bytes=_VMEM_LIMIT_BYTES,
                ),
                cost_estimate=cost,
            )(x2d, t2d)
            # 2 * 8 * 128 partial sums reduced in XLA — negligible.
            main_sum = jnp.sum(partials)

        sum_sq = main_sum + tail_sum

    loss = sum_sq / jnp.float32(n_elems)
    # Module's forward returns `input` unchanged; loss corresponds to `self.loss`.
    return x, loss


if __name__ == "__main__":
    key = jax.random.PRNGKey(0)
    k1, k2, k3, k4 = jax.random.split(key, 4)

    # Case 1: typical small NCHW feature map -> single-block fast path.
    shape = (2, 4, 16, 16)
    x = jax.random.normal(k1, shape, dtype=jnp.float32)
    target = jax.random.normal(k2, shape, dtype=jnp.float32)

    out, loss = content_loss(x, target)
    jax.block_until_ready((out, loss))
    ref_loss = jnp.mean((x - target) ** 2)
    assert jnp.allclose(loss, ref_loss, rtol=1e-5, atol=1e-6), (loss, ref_loss)
    assert jnp.array_equal(out, x)

    # Case 2: multi-step parallel grid with ragged tail + overhang block
    # (20 rows, block_rows=8 -> nblocks=3, chunks=2, inner=2, masked last steps).
    shape2 = (2, 5, 16, 16)
    x2 = jax.random.normal(k3, shape2, dtype=jnp.float32)
    t2 = jax.random.normal(k4, shape2, dtype=jnp.float32)

    out2, loss2 = content_loss(x2, t2, max_block_rows=8)
    jax.block_until_ready((out2, loss2))
    ref_loss2 = jnp.mean((x2 - t2) ** 2)
    assert jnp.allclose(loss2, ref_loss2, rtol=1e-5, atol=1e-6), (loss2, ref_loss2)
    assert jnp.array_equal(out2, x2)

    # Case 3: exact-cover parallel path (16 rows, block_rows=8 -> 2 chunks, no masking).
    out3, loss3 = content_loss(x, target, max_block_rows=8)
    jax.block_until_ready((out3, loss3))
    assert jnp.allclose(loss3, ref_loss, rtol=1e-5, atol=1e-6), (loss3, ref_loss)
    assert jnp.array_equal(out3, x)

    print("KERNEL_OK")
</pallas_src>

<mosaic_0001>
module attributes {stable_mosaic.version = 11 : i64} {
  func.func @_mse_sum_single_kernel(%arg0: i32, %arg1: memref<16x128xf32, #tpu.memory_space<vmem>>, %arg2: memref<16x128xf32, #tpu.memory_space<vmem>>, %arg3: memref<1x1xf32, #tpu.memory_space<smem>>) attributes {dimension_semantics = [#tpu.dimension_semantics<arbitrary>], iteration_bounds = array<i64: 1>, scalar_prefetch = 0 : i64, scratch_operands = 0 : i64, tpu.core_type = #tpu.core_type<tc>, window_params = [{pipeline_mode = #tpu.pipeline_mode<synchronous>, transform_indices = @transform_0, window_bounds = array<i64: 16, 128>}, {pipeline_mode = #tpu.pipeline_mode<synchronous>, transform_indices = @transform_1, window_bounds = array<i64: 16, 128>}, {transform_indices = @transform_2, window_bounds = array<i64: 1, 1>}]} {
    %c0 = arith.constant 0 : index
    %c0_0 = arith.constant 0 : index
    %0 = vector.load %arg1[%c0, %c0_0] : memref<16x128xf32, #tpu.memory_space<vmem>>, vector<16x128xf32>
    %c0_1 = arith.constant 0 : index
    %c0_2 = arith.constant 0 : index
    %1 = vector.load %arg2[%c0_1, %c0_2] : memref<16x128xf32, #tpu.memory_space<vmem>>, vector<16x128xf32>
    %2 = arith.subf %0, %1 : vector<16x128xf32>
    %3 = arith.mulf %2, %2 : vector<16x128xf32>
    %4 = vector.shape_cast %3 : vector<16x128xf32> to vector<1x16x128xf32>
    %cst = arith.constant dense<0.000000e+00> : vector<1xf32>
    %5 = vector.multi_reduction <add>, %4, %cst [1, 2] : vector<1x16x128xf32> to vector<1xf32>
    %6 = vector.shape_cast %5 : vector<1xf32> to vector<1x1x1xf32>
    %7 = vector.extract %6[0, 0, 0] : f32 from vector<1x1x1xf32>
    %c0_3 = arith.constant 0 : index
    %c0_4 = arith.constant 0 : index
    %8 = memref.load %arg3[%c0_3, %c0_4] : memref<1x1xf32, #tpu.memory_space<smem>>
    memref.store %7, %arg3[%c0_3, %c0_4] : memref<1x1xf32, #tpu.memory_space<smem>>
    return
  }
  func.func @transform_0(%arg0: i32) -> (i32, i32) {
    %c0_i32 = arith.constant 0 : i32
    %c0_i32_0 = arith.constant 0 : i32
    %c0_i32_1 = arith.constant 0 : i32
    return %c0_i32, %c0_i32_0 : i32, i32
  }
  func.func @transform_1(%arg0: i32) -> (i32, i32) {
    %c0_i32 = arith.constant 0 : i32
    %c0_i32_0 = arith.constant 0 : i32
    %c0_i32_1 = arith.constant 0 : i32
    return %c0_i32, %c0_i32_0 : i32, i32
  }
  func.func @transform_2(%arg0: i32) -> (i32, i32) {
    %c0_i32 = arith.constant 0 : i32
    %c0_i32_0 = arith.constant 0 : i32
    %c0_i32_1 = arith.constant 0 : i32
    return %c0_i32, %c0_i32_0 : i32, i32
  }
}

</mosaic_0001>

<bundles_post_ra>
// kernel: tpu_custom_call.1
= control target key start
LH: loop header
LB: loop body
LE: loop exit
PB: predicated region body
PF: predicated region fallthrough
CT: control target
= control target key end

     0   :  { %7 = vsyncpa [#allocation3], 0  ;;  %s198_s0 = inlined_call_operand.hbm [shape: f32[16,128], index: 0, kind: input, shape index: {}]   ;;  %s199_s1 = inlined_call_operand.hbm [shape: f32[16,128], index: 1, kind: input, shape index: {}]   ;;  %s200_s2 = inlined_call_operand.hbm [shape: f32[1,1], index: 2, kind: output, shape index: {}]  }
   0x1   :  { %8 = vsyncpa [#allocation6], 0 }
   0x2   :  { %9 = vsyncpa [#allocation4], 0  ;;  %s142_s9 = smov [#allocation2]   ;;  %s82_s13 = scalar_lea.hbm %s198_s0, 256 }
   0x3   :  { %s15_s10 = sshll.u32 %s142_s9, 4  ;;  %p83_p0 = scmp.ne.s32.totalorder %s198_s0, %s82_s13  ;;  %s16_s10 = int_to_ptr.vmem [resolvable:$true] %s15_s10 }
   0x4   :  { %p86_p1 = scmp.lt.u32.totalorder %s82_s13, %s198_s0 }
   0x6   :  { %p88_p2 = pnand %p86_p1, %p83_p0 }
   0x8   :  { %91 = shalt.err (!%p88_p2)
}
   0x9   :  { %s92_s18 = scalar_lea.vmem %s16_s10, 256  ;;  %p97_p4 = scmp.lt.s32.totalorder %s16_s10, %s16_s10 }
   0xa   :  { %p93_p3 = scmp.ne.s32.totalorder %s16_s10, %s92_s18  ;;  %p98_p5 = scmp.lt.s32.totalorder %s92_s18, %s92_s18 }
   0xc   :  { %p99_p6 = por %p98_p5, %p97_p4 }
   0xe   :  { %p100_p7 = pnand %p99_p6, %p93_p3 }
  0x10   :  { %103 = shalt.err (!%p100_p7)
}
  0x11   :  { %s143_s19 = smov 128   ;;  %s144_s20 = smov 8  }
  0x12   :  { %21 = dma.hbm_to_vmem [thread:$0]  %s198_s0, 256, %s16_s10, [#allocation3], %s143_s19, %s143_s19, %s144_s20  }
  0x13   :  { %s145_s23 = smov [#allocation5]   ;;  %s104_s27 = scalar_lea.hbm %s199_s1, 256 }
  0x14   :  { %s27_s24 = sshll.u32 %s145_s23, 4  ;;  %p105_p8 = scmp.ne.s32.totalorder %s199_s1, %s104_s27  ;;  %s28_s24 = int_to_ptr.vmem [resolvable:$true] %s27_s24 }
  0x15   :  { %p108_p9 = scmp.lt.u32.totalorder %s104_s27, %s199_s1 }
  0x17   :  { %p110_p10 = pnand %p108_p9, %p105_p8 }
  0x19   :  { %113 = shalt.err (!%p110_p10)
}
  0x1a   :  { %s114_s4 = scalar_lea.vmem %s28_s24, 256  ;;  %p119_p12 = scmp.lt.s32.totalorder %s28_s24, %s28_s24 }
  0x1b   :  { %p115_p11 = scmp.ne.s32.totalorder %s28_s24, %s114_s4  ;;  %p120_p13 = scmp.lt.s32.totalorder %s114_s4, %s114_s4 }
  0x1d   :  { %p121_p0 = por %p120_p13, %p119_p12 }
  0x1f   :  { %p122_p1 = pnand %p121_p0, %p115_p11 }
  0x21   :  { %125 = shalt.err (!%p122_p1)
}
  0x22   :  { %33 = dma.hbm_to_vmem [thread:$0]  %s199_s1, 256, %s28_s24, [#allocation6], %s143_s19, %s143_s19, %s144_s20  }
  0x23   :  { %136 = dma.done.wait [#allocation3], 256  }
  0x24   :  { %137 = vsyncadd [#allocation3], 4294967040 }
  0x25   :  { %138 = dma.done.wait [#allocation6], 256  }
  0x26   :  { %139 = vsyncadd [#allocation6], 4294967040  ;;  %v40_v0 = vld [vmem:[#allocation2] sm:$0xff]  ;;  %v41_v1 = vld [vmem:[#allocation2 + $0x8] sm:$0xff]  ;;  %s126_s8 = scalar_lea.hbm %s200_s2, 16 }
  0x27   :  { %v42_v2 = vld [vmem:[#allocation5] sm:$0xff]  ;;  %v43_v3 = vld [vmem:[#allocation5 + $0x8] sm:$0xff]  ;;  %p127_p2 = scmp.ne.s32.totalorder %s200_s2, %s126_s8  ;;  %p130_p3 = scmp.lt.u32.totalorder %s126_s8, %s200_s2 }
  0x28   :  { %v44_v4 = vsub.f32 %v40_v0, %v42_v2  ;;  %v45_v5 = vsub.f32 %v41_v1, %v43_v3 }
  0x29   :  { %p132_p4 = pnand %p130_p3, %p127_p2 }
  0x2a   :  { %v46_v6 = vmul.f32 %v44_v4, %v44_v4  ;;  %v47_v7 = vmul.f32 %v45_v5, %v45_v5 }
  0x2c   :  { %v48_v8 = vadd.f32 %v47_v7, %v46_v6 }
  0x2e   :  { %49 = vadd.xlane.f32.xlu0 %v48_v8 }
  0xbb   :  { %v50_v9 = vpop.xlane.xlu0 %49 }
  0xbc   :  { %v51_v10 = vrot.slane %v50_v9, 4 }
  0xbe   :  { %v52_v11 = vadd.f32 %v51_v10, %v50_v9 }
  0xc0   :  { %v53_v12 = vrot.slane %v52_v11, 2 }
  0xc2   :  { %v54_v13 = vadd.f32 %v53_v12, %v52_v11 }
  0xc4   :  { %v55_v14 = vrot.slane %v54_v13, 1 }
  0xc6   :  { %v56_v15 = vadd.f32 %v55_v14, %v54_v13 }
  0xc8   :  { %75 = vpush %v56_v15 }
  0xf9   :  { %s76_s1 = spop %75 }
  0xfa   :  { %59 = sst [smem:[#allocation7]] %s76_s1 }
  0xfb   :  { %135 = shalt.err (!%p132_p4)
}
  0xfc   :  { %s146_s13 = smov [#allocation7]  }
  0xfd   :  { %67 = dma.smem_to_hbm %s146_s13, 16, %s200_s2, [#allocation4]  }
  0xfe   :  { %140 = dma.done.wait [#allocation4], 16  }
  0xff   :  { %141 = vsyncadd [#allocation4], 4294967280 }
 0x100   :  { %71 = sfence }
 0x101   :  { %72 = vsyncpa [#allocation3], 1 }
 0x102   :  { %73 = vsyncpa [#allocation6], 1 }
 0x103   :  { %74 = vsyncpa [#allocation4], 1 }

</bundles_post_ra>
